<compile_context>
chip_gen: v6e
topology: v6e:2x2x1
jax: 0.10.0
libtpu: 0.0.40
codegen_flags: <defaults>
</compile_context>

<pallas_src>
import math
import functools

import jax
import jax.numpy as jnp
from jax import lax
from jax.experimental import pallas as pl
from jax.experimental.pallas import tpu as pltpu


def _conv_same_kernel(x_ref, w_ref, b_ref, o_ref, *, KH, KW, sh, sw, dh, dw, TH, Wo):
    """One (batch element, output-row block) per grid step.

    x_ref : (1, Hpad, Wpad, Cin)  padded input image (VMEM; resident across the hb axis)
    w_ref : (KH, KW, Cin, Cout)   full weights (VMEM; resident across the whole grid)
    b_ref : (1, Cout)             bias
    o_ref : (1, TH, Wo, Cout)     this row block of the output
    """
    hb = pl.program_id(1)
    cin = x_ref.shape[-1]
    cout = o_ref.shape[-1]

    # First padded-input row used by this output-row block (alignment hint for the ds start).
    row0 = pl.multiple_of(hb * (TH * sh), TH * sh)

    # One matmul per kernel tap over the whole block: M = TH*Wo, K = Cin, N = Cout.
    # (TH, Wo, Cin) -> (TH*Wo, Cin) is a sublane-only merge (free when Wo % 8 == 0,
    # which holds for every SemanticHead feature-map width).
    acc = None
    for kh in range(KH):
        for kw in range(KW):
            rstart = row0 + kh * dh
            rows = pl.ds(rstart, TH) if sh == 1 else pl.ds(rstart, TH, sh)
            cols = pl.ds(kw * dw, Wo) if sw == 1 else pl.ds(kw * dw, Wo, sw)
            xs = x_ref[0, rows, cols, :]                      # (TH, Wo, Cin)
            xs2 = xs.reshape(TH * Wo, cin)                    # (TH*Wo, Cin)
            contrib = jnp.dot(xs2, w_ref[kh, kw, :, :],
                              preferred_element_type=jnp.float32)
            acc = contrib if acc is None else acc + contrib

    # Bias added once to the whole block; single bulk store.
    acc = acc + b_ref[...].astype(jnp.float32)                # (TH*Wo, Cout)
    o_ref[...] = acc.reshape(1, TH, Wo, cout).astype(o_ref.dtype)


def _pick_row_block(Ho, Wo, Cout):
    """Largest divisor of Ho whose f32 accumulator stays ~<= 512 KiB (and M <= 2048 rows)."""
    budget_rows = max(Wo, min(2048, (512 * 1024) // max(1, Cout * 4)))
    th = 1
    for cand in range(1, Ho + 1):
        if Ho % cand == 0 and cand * Wo <= budget_rows:
            th = cand
    return th


def conv2d_static_same_padding(x_nchw, w_oihw, bias, stride=(1, 1), dilation=(1, 1),
                               row_block=None):
    """Reproduces Conv2dStaticSamePadding.forward (NCHW in / NCHW out, groups=1)."""
    N, Cin, H, W = x_nchw.shape
    Cout, Cin_w, KH, KW = w_oihw.shape
    assert Cin == Cin_w, "groups != 1 is not supported by this kernel"
    sh, sw = (stride, stride) if isinstance(stride, int) else tuple(stride)
    dh, dw = (dilation, dilation) if isinstance(dilation, int) else tuple(dilation)

    # TF/Keras "SAME" amounts, exactly as the PyTorch module computes them.
    # (The module ignores dilation in this formula — spec-faithful, not "true" SAME.)
    extra_h = (math.ceil(W / sw) - 1) * sw - W + KW
    extra_v = (math.ceil(H / sh) - 1) * sh - H + KH
    left = extra_h // 2
    right = extra_h - left
    top = extra_v // 2
    bottom = extra_v - top

    # Glue: NCHW -> NHWC; F.pad semantics (negative pad => crop, positive => zero pad).
    x = jnp.transpose(x_nchw, (0, 2, 3, 1))
    x = x[:, max(0, -top):H - max(0, -bottom), max(0, -left):W - max(0, -right), :]
    x = jnp.pad(x, ((0, 0),
                    (max(0, top), max(0, bottom)),
                    (max(0, left), max(0, right)),
                    (0, 0)))
    Hpad = H + extra_v
    Wpad = W + extra_h

    # Output spatial dims (PyTorch Conv2d formula on the padded input).
    eff_kh = dh * (KH - 1) + 1
    eff_kw = dw * (KW - 1) + 1
    Ho = (Hpad - eff_kh) // sh + 1
    Wo = (Wpad - eff_kw) // sw + 1

    w_hwio = jnp.transpose(w_oihw, (2, 3, 1, 0))            # (KH, KW, Cin, Cout)
    b2 = bias.reshape(1, Cout)

    if row_block is None:
        TH = _pick_row_block(Ho, Wo, Cout)
    else:
        assert Ho % row_block == 0, (Ho, row_block)
        TH = row_block

    kernel = functools.partial(_conv_same_kernel, KH=KH, KW=KW, sh=sh, sw=sw,
                               dh=dh, dw=dw, TH=TH, Wo=Wo)

    # Explicit VMEM budget: double-buffered input/output blocks + resident weights/bias.
    itemsize = jnp.dtype(x.dtype).itemsize
    in_block_bytes = Hpad * Wpad * Cin * itemsize
    out_block_bytes = TH * Wo * Cout * itemsize
    w_bytes = KH * KW * Cin * Cout * jnp.dtype(w_hwio.dtype).itemsize
    est_vmem = 2 * (in_block_bytes + out_block_bytes) + 2 * (w_bytes + Cout * 4) + (1 << 20)
    vmem_limit = int(max(32 * 1024 * 1024, est_vmem))

    out_nhwc = pl.pallas_call(
        kernel,
        out_shape=jax.ShapeDtypeStruct((N, Ho, Wo, Cout), x.dtype),
        grid=(N, Ho // TH),
        in_specs=[
            pl.BlockSpec((1, Hpad, Wpad, Cin), lambda n, hb: (n, 0, 0, 0)),
            pl.BlockSpec((KH, KW, Cin, Cout), lambda n, hb: (0, 0, 0, 0)),
            pl.BlockSpec((1, Cout), lambda n, hb: (0, 0)),
        ],
        out_specs=pl.BlockSpec((1, TH, Wo, Cout), lambda n, hb: (n, hb, 0, 0)),
        compiler_params=pltpu.CompilerParams(
            dimension_semantics=("parallel", "parallel"),
            vmem_limit_bytes=vmem_limit),
    )(x, w_hwio, b2)

    # Glue: NHWC -> NCHW to match the PyTorch module's output convention.
    return jnp.transpose(out_nhwc, (0, 3, 1, 2))


if __name__ == "__main__":
    # Small config consistent with the nn.Conv2d inside the module.
    in_channels, out_channels = 4, 8
    kernel_size = 3
    stride = (1, 1)
    dilation = (1, 1)

    key = jax.random.PRNGKey(0)
    kx, kw, kb = jax.random.split(key, 3)

    fan_in = in_channels * kernel_size * kernel_size
    w_oihw = (jax.random.normal(kw, (out_channels, in_channels, kernel_size, kernel_size),
                                dtype=jnp.float32) / math.sqrt(fan_in))
    bias = jax.random.normal(kb, (out_channels,), dtype=jnp.float32) * 0.1

    x = jax.random.normal(kx, (2, 4, 16, 16), dtype=jnp.float32)   # NCHW, as in PyTorch

    # row_block=8 exercises the (batch, row-block) grid (grid = (2, 2)).
    out = conv2d_static_same_padding(x, w_oihw, bias, stride=stride, dilation=dilation,
                                     row_block=8)
    out = jax.block_until_ready(out)

    # Reference: identical SAME padding, then VALID conv.
    H, W = x.shape[-2:]
    extra_h = (math.ceil(W / stride[1]) - 1) * stride[1] - W + kernel_size
    extra_v = (math.ceil(H / stride[0]) - 1) * stride[0] - H + kernel_size
    left = extra_h // 2
    top = extra_v // 2
    x_pad = jnp.pad(x, ((0, 0), (0, 0),
                        (top, extra_v - top), (left, extra_h - left)))
    ref = lax.conv_general_dilated(
        x_pad, w_oihw, window_strides=stride, padding="VALID",
        rhs_dilation=dilation, dimension_numbers=("NCHW", "OIHW", "NCHW"))
    ref = ref + bias[None, :, None, None]

    assert out.shape == ref.shape, (out.shape, ref.shape)
    assert jnp.allclose(out, ref, atol=1e-4, rtol=1e-4), float(jnp.max(jnp.abs(out - ref)))

    print("KERNEL_OK")
</pallas_src>

<mosaic_0001>
module attributes {stable_mosaic.version = 11 : i64} {
  func.func @_conv_same_kernel(%arg0: i32, %arg1: i32, %arg2: memref<1x18x18x4xf32, #tpu.memory_space<vmem>>, %arg3: memref<3x3x4x8xf32, #tpu.memory_space<vmem>>, %arg4: memref<1x8xf32, #tpu.memory_space<vmem>>, %arg5: memref<1x8x16x8xf32, #tpu.memory_space<vmem>>) attributes {dimension_semantics = [#tpu.dimension_semantics<parallel>, #tpu.dimension_semantics<parallel>], iteration_bounds = array<i64: 2, 2>, scalar_prefetch = 0 : i64, scratch_operands = 0 : i64, tpu.core_type = #tpu.core_type<tc>, window_params = [{transform_indices = @transform_0, window_bounds = array<i64: 1, 18, 18, 4>}, {pipeline_mode = #tpu.pipeline_mode<synchronous>, transform_indices = @transform_1, window_bounds = array<i64: 3, 3, 4, 8>}, {pipeline_mode = #tpu.pipeline_mode<synchronous>, transform_indices = @transform_2, window_bounds = array<i64: 1, 8>}, {transform_indices = @transform_3, window_bounds = array<i64: 1, 8, 16, 8>}]} {
    %c8_i32 = arith.constant 8 : i32
    %0 = arith.muli %arg1, %c8_i32 : i32
    %1 = tpu.assume_multiple %0, 8 : i32
    %c0_i32 = arith.constant 0 : i32
    %2 = arith.addi %1, %c0_i32 : i32
    %c0 = arith.constant 0 : index
    %3 = arith.index_cast %2 : i32 to index
    %c0_0 = arith.constant 0 : index
    %c0_1 = arith.constant 0 : index
    %4 = vector.load %arg2[%c0, %3, %c0_0, %c0_1] : memref<1x18x18x4xf32, #tpu.memory_space<vmem>>, vector<1x8x16x4xf32>
    %5 = vector.shape_cast %4 : vector<1x8x16x4xf32> to vector<8x16x4xf32>
    %6 = vector.shape_cast %5 : vector<8x16x4xf32> to vector<128x4xf32>
    %c0_2 = arith.constant 0 : index
    %c0_3 = arith.constant 0 : index
    %c0_4 = arith.constant 0 : index
    %c0_5 = arith.constant 0 : index
    %7 = vector.load %arg3[%c0_2, %c0_3, %c0_4, %c0_5] : memref<3x3x4x8xf32, #tpu.memory_space<vmem>>, vector<1x1x4x8xf32>
    %8 = vector.shape_cast %7 : vector<1x1x4x8xf32> to vector<4x8xf32>
    %cst = arith.constant dense<0.000000e+00> : vector<128x8xf32>
    %9 = tpu.matmul %6, %8, %cst {dimension_numbers = #tpu.dot_dimension_numbers<[1], [0], [0], [1], [0, 0, 1, 1], [], []>} : vector<128x4xf32>, vector<4x8xf32>, vector<128x8xf32> -> vector<128x8xf32>
    %c0_i32_6 = arith.constant 0 : i32
    %10 = arith.addi %1, %c0_i32_6 : i32
    %c0_7 = arith.constant 0 : index
    %11 = arith.index_cast %10 : i32 to index
    %c1 = arith.constant 1 : index
    %c0_8 = arith.constant 0 : index
    %12 = vector.load %arg2[%c0_7, %11, %c1, %c0_8] : memref<1x18x18x4xf32, #tpu.memory_space<vmem>>, vector<1x8x16x4xf32>
    %13 = vector.shape_cast %12 : vector<1x8x16x4xf32> to vector<8x16x4xf32>
    %14 = vector.shape_cast %13 : vector<8x16x4xf32> to vector<128x4xf32>
    %c0_9 = arith.constant 0 : index
    %c1_10 = arith.constant 1 : index
    %c0_11 = arith.constant 0 : index
    %c0_12 = arith.constant 0 : index
    %15 = vector.load %arg3[%c0_9, %c1_10, %c0_11, %c0_12] : memref<3x3x4x8xf32, #tpu.memory_space<vmem>>, vector<1x1x4x8xf32>
    %16 = vector.shape_cast %15 : vector<1x1x4x8xf32> to vector<4x8xf32>
    %cst_13 = arith.constant dense<0.000000e+00> : vector<128x8xf32>
    %17 = tpu.matmul %14, %16, %cst_13 {dimension_numbers = #tpu.dot_dimension_numbers<[1], [0], [0], [1], [0, 0, 1, 1], [], []>} : vector<128x4xf32>, vector<4x8xf32>, vector<128x8xf32> -> vector<128x8xf32>
    %18 = arith.addf %9, %17 : vector<128x8xf32>
    %c0_i32_14 = arith.constant 0 : i32
    %19 = arith.addi %1, %c0_i32_14 : i32
    %c0_15 = arith.constant 0 : index
    %20 = arith.index_cast %19 : i32 to index
    %c2 = arith.constant 2 : index
    %c0_16 = arith.constant 0 : index
    %21 = vector.load %arg2[%c0_15, %20, %c2, %c0_16] : memref<1x18x18x4xf32, #tpu.memory_space<vmem>>, vector<1x8x16x4xf32>
    %22 = vector.shape_cast %21 : vector<1x8x16x4xf32> to vector<8x16x4xf32>
    %23 = vector.shape_cast %22 : vector<8x16x4xf32> to vector<128x4xf32>
    %c0_17 = arith.constant 0 : index
    %c2_18 = arith.constant 2 : index
    %c0_19 = arith.constant 0 : index
    %c0_20 = arith.constant 0 : index
    %24 = vector.load %arg3[%c0_17, %c2_18, %c0_19, %c0_20] : memref<3x3x4x8xf32, #tpu.memory_space<vmem>>, vector<1x1x4x8xf32>
    %25 = vector.shape_cast %24 : vector<1x1x4x8xf32> to vector<4x8xf32>
    %cst_21 = arith.constant dense<0.000000e+00> : vector<128x8xf32>
    %26 = tpu.matmul %23, %25, %cst_21 {dimension_numbers = #tpu.dot_dimension_numbers<[1], [0], [0], [1], [0, 0, 1, 1], [], []>} : vector<128x4xf32>, vector<4x8xf32>, vector<128x8xf32> -> vector<128x8xf32>
    %27 = arith.addf %18, %26 : vector<128x8xf32>
    %c1_i32 = arith.constant 1 : i32
    %28 = arith.addi %1, %c1_i32 : i32
    %c0_22 = arith.constant 0 : index
    %29 = arith.index_cast %28 : i32 to index
    %c0_23 = arith.constant 0 : index
    %c0_24 = arith.constant 0 : index
    %30 = vector.load %arg2[%c0_22, %29, %c0_23, %c0_24] : memref<1x18x18x4xf32, #tpu.memory_space<vmem>>, vector<1x8x16x4xf32>
    %31 = vector.shape_cast %30 : vector<1x8x16x4xf32> to vector<8x16x4xf32>
    %32 = vector.shape_cast %31 : vector<8x16x4xf32> to vector<128x4xf32>
    %c1_25 = arith.constant 1 : index
    %c0_26 = arith.constant 0 : index
    %c0_27 = arith.constant 0 : index
    %c0_28 = arith.constant 0 : index
    %33 = vector.load %arg3[%c1_25, %c0_26, %c0_27, %c0_28] : memref<3x3x4x8xf32, #tpu.memory_space<vmem>>, vector<1x1x4x8xf32>
    %34 = vector.shape_cast %33 : vector<1x1x4x8xf32> to vector<4x8xf32>
    %cst_29 = arith.constant dense<0.000000e+00> : vector<128x8xf32>
    %35 = tpu.matmul %32, %34, %cst_29 {dimension_numbers = #tpu.dot_dimension_numbers<[1], [0], [0], [1], [0, 0, 1, 1], [], []>} : vector<128x4xf32>, vector<4x8xf32>, vector<128x8xf32> -> vector<128x8xf32>
    %36 = arith.addf %27, %35 : vector<128x8xf32>
    %c1_i32_30 = arith.constant 1 : i32
    %37 = arith.addi %1, %c1_i32_30 : i32
    %c0_31 = arith.constant 0 : index
    %38 = arith.index_cast %37 : i32 to index
    %c1_32 = arith.constant 1 : index
    %c0_33 = arith.constant 0 : index
    %39 = vector.load %arg2[%c0_31, %38, %c1_32, %c0_33] : memref<1x18x18x4xf32, #tpu.memory_space<vmem>>, vector<1x8x16x4xf32>
    %40 = vector.shape_cast %39 : vector<1x8x16x4xf32> to vector<8x16x4xf32>
    %41 = vector.shape_cast %40 : vector<8x16x4xf32> to vector<128x4xf32>
    %c1_34 = arith.constant 1 : index
    %c1_35 = arith.constant 1 : index
    %c0_36 = arith.constant 0 : index
    %c0_37 = arith.constant 0 : index
    %42 = vector.load %arg3[%c1_34, %c1_35, %c0_36, %c0_37] : memref<3x3x4x8xf32, #tpu.memory_space<vmem>>, vector<1x1x4x8xf32>
    %43 = vector.shape_cast %42 : vector<1x1x4x8xf32> to vector<4x8xf32>
    %cst_38 = arith.constant dense<0.000000e+00> : vector<128x8xf32>
    %44 = tpu.matmul %41, %43, %cst_38 {dimension_numbers = #tpu.dot_dimension_numbers<[1], [0], [0], [1], [0, 0, 1, 1], [], []>} : vector<128x4xf32>, vector<4x8xf32>, vector<128x8xf32> -> vector<128x8xf32>
    %45 = arith.addf %36, %44 : vector<128x8xf32>
    %c1_i32_39 = arith.constant 1 : i32
    %46 = arith.addi %1, %c1_i32_39 : i32
    %c0_40 = arith.constant 0 : index
    %47 = arith.index_cast %46 : i32 to index
    %c2_41 = arith.constant 2 : index
    %c0_42 = arith.constant 0 : index
    %48 = vector.load %arg2[%c0_40, %47, %c2_41, %c0_42] : memref<1x18x18x4xf32, #tpu.memory_space<vmem>>, vector<1x8x16x4xf32>
    %49 = vector.shape_cast %48 : vector<1x8x16x4xf32> to vector<8x16x4xf32>
    %50 = vector.shape_cast %49 : vector<8x16x4xf32> to vector<128x4xf32>
    %c1_43 = arith.constant 1 : index
    %c2_44 = arith.constant 2 : index
    %c0_45 = arith.constant 0 : index
    %c0_46 = arith.constant 0 : index
    %51 = vector.load %arg3[%c1_43, %c2_44, %c0_45, %c0_46] : memref<3x3x4x8xf32, #tpu.memory_space<vmem>>, vector<1x1x4x8xf32>
    %52 = vector.shape_cast %51 : vector<1x1x4x8xf32> to vector<4x8xf32>
    %cst_47 = arith.constant dense<0.000000e+00> : vector<128x8xf32>
    %53 = tpu.matmul %50, %52, %cst_47 {dimension_numbers = #tpu.dot_dimension_numbers<[1], [0], [0], [1], [0, 0, 1, 1], [], []>} : vector<128x4xf32>, vector<4x8xf32>, vector<128x8xf32> -> vector<128x8xf32>
    %54 = arith.addf %45, %53 : vector<128x8xf32>
    %c2_i32 = arith.constant 2 : i32
    %55 = arith.addi %1, %c2_i32 : i32
    %c0_48 = arith.constant 0 : index
    %56 = arith.index_cast %55 : i32 to index
    %c0_49 = arith.constant 0 : index
    %c0_50 = arith.constant 0 : index
    %57 = vector.load %arg2[%c0_48, %56, %c0_49, %c0_50] : memref<1x18x18x4xf32, #tpu.memory_space<vmem>>, vector<1x8x16x4xf32>
    %58 = vector.shape_cast %57 : vector<1x8x16x4xf32> to vector<8x16x4xf32>
    %59 = vector.shape_cast %58 : vector<8x16x4xf32> to vector<128x4xf32>
    %c2_51 = arith.constant 2 : index
    %c0_52 = arith.constant 0 : index
    %c0_53 = arith.constant 0 : index
    %c0_54 = arith.constant 0 : index
    %60 = vector.load %arg3[%c2_51, %c0_52, %c0_53, %c0_54] : memref<3x3x4x8xf32, #tpu.memory_space<vmem>>, vector<1x1x4x8xf32>
    %61 = vector.shape_cast %60 : vector<1x1x4x8xf32> to vector<4x8xf32>
    %cst_55 = arith.constant dense<0.000000e+00> : vector<128x8xf32>
    %62 = tpu.matmul %59, %61, %cst_55 {dimension_numbers = #tpu.dot_dimension_numbers<[1], [0], [0], [1], [0, 0, 1, 1], [], []>} : vector<128x4xf32>, vector<4x8xf32>, vector<128x8xf32> -> vector<128x8xf32>
    %63 = arith.addf %54, %62 : vector<128x8xf32>
    %c2_i32_56 = arith.constant 2 : i32
    %64 = arith.addi %1, %c2_i32_56 : i32
    %c0_57 = arith.constant 0 : index
    %65 = arith.index_cast %64 : i32 to index
    %c1_58 = arith.constant 1 : index
    %c0_59 = arith.constant 0 : index
    %66 = vector.load %arg2[%c0_57, %65, %c1_58, %c0_59] : memref<1x18x18x4xf32, #tpu.memory_space<vmem>>, vector<1x8x16x4xf32>
    %67 = vector.shape_cast %66 : vector<1x8x16x4xf32> to vector<8x16x4xf32>
    %68 = vector.shape_cast %67 : vector<8x16x4xf32> to vector<128x4xf32>
    %c2_60 = arith.constant 2 : index
    %c1_61 = arith.constant 1 : index
    %c0_62 = arith.constant 0 : index
    %c0_63 = arith.constant 0 : index
    %69 = vector.load %arg3[%c2_60, %c1_61, %c0_62, %c0_63] : memref<3x3x4x8xf32, #tpu.memory_space<vmem>>, vector<1x1x4x8xf32>
    %70 = vector.shape_cast %69 : vector<1x1x4x8xf32> to vector<4x8xf32>
    %cst_64 = arith.constant dense<0.000000e+00> : vector<128x8xf32>
    %71 = tpu.matmul %68, %70, %cst_64 {dimension_numbers = #tpu.dot_dimension_numbers<[1], [0], [0], [1], [0, 0, 1, 1], [], []>} : vector<128x4xf32>, vector<4x8xf32>, vector<128x8xf32> -> vector<128x8xf32>
    %72 = arith.addf %63, %71 : vector<128x8xf32>
    %c2_i32_65 = arith.constant 2 : i32
    %73 = arith.addi %1, %c2_i32_65 : i32
    %c0_66 = arith.constant 0 : index
    %74 = arith.index_cast %73 : i32 to index
    %c2_67 = arith.constant 2 : index
    %c0_68 = arith.constant 0 : index
    %75 = vector.load %arg2[%c0_66, %74, %c2_67, %c0_68] : memref<1x18x18x4xf32, #tpu.memory_space<vmem>>, vector<1x8x16x4xf32>
    %76 = vector.shape_cast %75 : vector<1x8x16x4xf32> to vector<8x16x4xf32>
    %77 = vector.shape_cast %76 : vector<8x16x4xf32> to vector<128x4xf32>
    %c2_69 = arith.constant 2 : index
    %c2_70 = arith.constant 2 : index
    %c0_71 = arith.constant 0 : index
    %c0_72 = arith.constant 0 : index
    %78 = vector.load %arg3[%c2_69, %c2_70, %c0_71, %c0_72] : memref<3x3x4x8xf32, #tpu.memory_space<vmem>>, vector<1x1x4x8xf32>
    %79 = vector.shape_cast %78 : vector<1x1x4x8xf32> to vector<4x8xf32>
    %cst_73 = arith.constant dense<0.000000e+00> : vector<128x8xf32>
    %80 = tpu.matmul %77, %79, %cst_73 {dimension_numbers = #tpu.dot_dimension_numbers<[1], [0], [0], [1], [0, 0, 1, 1], [], []>} : vector<128x4xf32>, vector<4x8xf32>, vector<128x8xf32> -> vector<128x8xf32>
    %81 = arith.addf %72, %80 : vector<128x8xf32>
    %c0_74 = arith.constant 0 : index
    %c0_75 = arith.constant 0 : index
    %82 = vector.load %arg4[%c0_74, %c0_75] : memref<1x8xf32, #tpu.memory_space<vmem>>, vector<1x8xf32>
    %83 = vector.broadcast %82 : vector<1x8xf32> to vector<128x8xf32>
    %84 = arith.addf %81, %83 : vector<128x8xf32>
    %85 = vector.shape_cast %84 : vector<128x8xf32> to vector<1x8x16x8xf32>
    %c0_76 = arith.constant 0 : index
    %c0_77 = arith.constant 0 : index
    %c0_78 = arith.constant 0 : index
    %c0_79 = arith.constant 0 : index
    %86 = vector.load %arg5[%c0_76, %c0_77, %c0_78, %c0_79] : memref<1x8x16x8xf32, #tpu.memory_space<vmem>>, vector<1x8x16x8xf32>
    tpu.vector_store %arg5[%c0_76, %c0_77, %c0_78, %c0_79], %85 {strides = array<i32>} : memref<1x8x16x8xf32, #tpu.memory_space<vmem>>, vector<1x8x16x8xf32>,
    return
  }
  func.func @transform_0(%arg0: i32, %arg1: i32) -> (i32, i32, i32, i32) {
    %c0_i32 = arith.constant 0 : i32
    %c0_i32_0 = arith.constant 0 : i32
    %c0_i32_1 = arith.constant 0 : i32
    %c0_i32_2 = arith.constant 0 : i32
    return %arg0, %c0_i32, %c0_i32_0, %c0_i32_1 : i32, i32, i32, i32
  }
  func.func @transform_1(%arg0: i32, %arg1: i32) -> (i32, i32, i32, i32) {
    %c0_i32 = arith.constant 0 : i32
    %c0_i32_0 = arith.constant 0 : i32
    %c0_i32_1 = arith.constant 0 : i32
    %c0_i32_2 = arith.constant 0 : i32
    %c0_i32_3 = arith.constant 0 : i32
    return %c0_i32, %c0_i32_0, %c0_i32_1, %c0_i32_2 : i32, i32, i32, i32
  }
  func.func @transform_2(%arg0: i32, %arg1: i32) -> (i32, i32) {
    %c0_i32 = arith.constant 0 : i32
    %c0_i32_0 = arith.constant 0 : i32
    %c0_i32_1 = arith.constant 0 : i32
    return %c0_i32, %c0_i32_0 : i32, i32
  }
  func.func @transform_3(%arg0: i32, %arg1: i32) -> (i32, i32, i32, i32) {
    %c0_i32 = arith.constant 0 : i32
    %c0_i32_0 = arith.constant 0 : i32
    %c0_i32_1 = arith.constant 0 : i32
    return %arg0, %arg1, %c0_i32, %c0_i32_0 : i32, i32, i32, i32
  }
}

</mosaic_0001>

<bundles_post_ra>
// kernel: tpu_custom_call.1
= control target key start
LH: loop header
LB: loop body
LE: loop exit
PB: predicated region body
PF: predicated region fallthrough
CT: control target
= control target key end

     0   :  { %s3150_s12 = smov 0   ;;  %s3152_s13 = smov 0   ;;  %s3937_s0 = inlined_call_operand.vmem [shape: f32[2,18,18,4], index: 0, kind: input, shape index: {}]   ;;  %s3938_s1 = inlined_call_operand.vmem [shape: f32[3,3,4,8], index: 1, kind: input, shape index: {}]   ;;  %s3939_s2 = inlined_call_operand.vmem [shape: f32[1,8], index: 2, kind: input, shape index: {}]   ;;  %s3940_s3 = inlined_call_operand.vmem [shape: f32[2,16,16,8], index: 3, kind: output, shape index: {}]  }
   0x1   :  { %s3154_s14 = smov 0   ;;  %s3156_s15 = smov 0  }
   0x2   :  { %s3158_s16 = smov 0  }
   0x3 LB: > { %s22_s17 = sadd.s32 1, %s3120_s14  ;;  %s25_s18 = sadd.s32 1, %s3124_s15  ;;  %s3128_s16 = sphi %s3158_s16, %s13_s16   ;;  %s3124_s15 = sphi %s3156_s15, %s3980_s15   ;;  %s3120_s14 = sphi %s3154_s14, %s3979_s14   ;;  %s3116_s13 = sphi %s3152_s13, %s3978_s13   ;;  %s3112_s12 = sphi %s3150_s12, %s3977_s12  }
   0x4   : > { %p23_p0 = scmp.ge.s32.totalorder %s22_s17, 2  ;;  %p2388_p1 = scmp.ge.s32.totalorder %s3128_s16, 1 }
   0x5   : > { %p151_p2 = scmp.lt.s32.totalorder %s3128_s16, 5 }
   0x6   : > { %s3982_s17 = smov (%p23_p0, %s22_s17), 0  ;;  %s3984_s18 = smov (!%p23_p0, %s25_s18), %s3124_s15 }
   0x7   : > { %p152_p3 = pnand %p2388_p1, %p151_p2  ;;  %p27_p4 = scmp.ge.s32.totalorder %s3984_s18, 2 }
   0x9   : > { %s3986_s18 = smov (%p27_p4, %s3984_s18), 0  ;;  %155 = sbr.rel (%p152_p3) target bundleno = 366 (0x16e), region = 32 }
   0xe   : > { %v2396_v0 = vld [vmem:[%s3938_s1 + $0x4] sm:$0xf]  ;;  %vm283_vm0 = vcmask 1043456   ;;  %p180_p5 = scmp.lt.s32.totalorder %s3116_s13, 1  ;;  %v215_v1 = vld [vmem:[%s3938_s1] sm:$0xf] }
   0xf   : > { %3047 = vmatprep.subr.msk.mxu1 %vm283_vm0, %v2396_v0  ;;  %2813 = vmatprep.subr.msk.mxu0 %vm283_vm0, %v2396_v0  ;;  %v2431_v2 = vld [vmem:[%s3938_s1 + $0x8] sm:$0xf]  ;;  %s2395_s25 = smul.u32 192, %s3112_s12  ;;  %vm234_vm1 = vcmask 31744   ;;  %v2467_v9 = vld [vmem:[%s3938_s1 + $0xc] sm:$0xf] }
  0x10   : > { %3048 = vmatpush3.msk.msra.mxu1 %vm283_vm0, %v2396_v0  ;;  %2814 = vmatpush3.msk.msra.mxu0 %vm283_vm0, %v2396_v0  ;;  %s3988_s13 = smov (!%p180_p5, %s3116_s13), 1  ;;  %v2501_v10 = vld [vmem:[%s3938_s1 + $0x10] sm:$0xf]  ;;  %v3307_v27 = vld [vmem:[%s3938_s1 + $0x14] sm:$0xf]  ;;  %s2390_s23 = sshll.u32 %s3112_s12, 3 }
  0x11   : > { %2839 = vmatprep.subr.msk.mxu1 %vm283_vm0, %v215_v1  ;;  %2865 = vmatprep.subr.msk.mxu0 %vm283_vm0, %v2431_v2  ;;  %s3049_s26 = smul.u32 432, %s3988_s13  ;;  %v3312_v28 = vld [vmem:[%s3938_s1 + $0x18] sm:$0xf]  ;;  %v2605_v55 = vld [vmem:[%s3938_s1 + $0x1c] sm:$0xf]  ;;  %p188_p6 = scmp.lt.s32.totalorder %s2390_s23, 15 }
  0x12   : > { %v2639_v56 = vld [vmem:[%s3938_s1 + $0x20] sm:$0xf]  ;;  %s2392_s24 = sshll.u32 %s3988_s13, 5  ;;  %vm2267_vm2 = vcmask 64512  }
  0x13   : > { %s184_s29 = scalar_lea.vmem %s3937_s0, %s3049_s26  ;;  %s3990_s23 = smov (!%p188_p6, %s2390_s23), 15 }
  0x14   : > { %s3204_s30 = scalar_lea.vmem %s184_s29, %s2395_s25  ;;  %s2391_s12 = sshll.u32 %s3990_s23, 1 }
  0x15   : > { %v216_v3 = vld [vmem:[%s3204_s30 + $0x1] sm:$0xff]  ;;  %v217_v5 = vld [vmem:[%s3204_s30 + $0x9] sm:$0xff]  ;;  %v3218_v7 = vld [vmem:[%s3204_s30 + $0x19] sm:$0xff]  ;;  %s192_s25 = sadd.s32 %s2392_s24, %s2391_s12 }
  0x16   : > { %v3208_v4 = vld [vmem:[%s3204_s30 + $0x61] sm:$0xff]  ;;  %2815 = vmatprep.mubr.msk.f32.mxu0 %vm234_vm1, %v216_v3  ;;  %v3215_v6 = vld [vmem:[%s3204_s30 + $0x69] sm:$0xff]  ;;  %v3221_v8 = vld [vmem:[%s3204_s30 + $0x79] sm:$0xff]  ;;  %s2393_s13 = sshll.u32 %s192_s25, 3 }
  0x17   : > { %2827 = vmatprep.mubr.msk.f32.mxu1 %vm234_vm1, %v3208_v4  ;;  %2816 = vmatmul.mubr.msk.f32.vlgmr.msra.gmra.mxu0 %vm234_vm1, %v217_v5  ;;  %v3235_v11 = vld [vmem:[%s3204_s30 + $0x21] sm:$0xff]  ;;  %v3245_v13 = vld [vmem:[%s3204_s30 + $0x31] sm:$0xff]  ;;  %v3261_v15 = vld [vmem:[%s3204_s30 + $0x39] sm:$0xff] }
  0x18   : > { %2828 = vmatmul.mubr.msk.f32.vlgmr.msra.gmra.mxu1 %vm234_vm1, %v3215_v6  ;;  %2866 = vmatpush3.msk.msra.mxu0 %vm283_vm0, %v2431_v2  ;;  %v3238_v12 = vld [vmem:[%s3204_s30 + $0x81] sm:$0xff]  ;;  %v3248_v14 = vld [vmem:[%s3204_s30 + $0x91] sm:$0xff]  ;;  %v3264_v16 = vld [vmem:[%s3204_s30 + $0x99] sm:$0xff] }
  0x19   : > { %2840 = vmatpush3.msk.msra.mxu1 %vm283_vm0, %v215_v1  ;;  %2818 = vmatprep.mubr.msk.f32.mxu0 %vm234_vm1, %v3218_v7  ;;  %v3267_v17 = vld [vmem:[%s3204_s30 + $0x49] sm:$0xff]  ;;  %v3281_v19 = vld [vmem:[%s3204_s30 + $0x51] sm:$0xff]  ;;  %v199_v21 = vld [vmem:[%s3204_s30] sm:$0xff] }
  0x1a   : > { %2830 = vmatprep.mubr.msk.f32.mxu1 %vm234_vm1, %v3221_v8  ;;  %2891 = vmatprep.subr.msk.mxu1 %vm283_vm0, %v2467_v9  ;;  %v3270_v18 = vld [vmem:[%s3204_s30 + $0xa9] sm:$0xff]  ;;  %v3284_v20 = vld [vmem:[%s3204_s30 + $0xb1] sm:$0xff]  ;;  %v3300_v26 = vld [vmem:[%s3204_s30 + $0x1a] sm:$0xff] }
  0x1b   : > { %2917 = vmatprep.subr.msk.mxu0 %vm283_vm0, %v2501_v10  ;;  %2819 = vmatmul.mubr.msk.f32.gmra.mxu0 %vm234_vm1, %v3235_v11  ;;  %v628_v22 = vld [vmem:[%s3204_s30 + $0x2] sm:$0xff]  ;;  %v629_v24 = vld [vmem:[%s3204_s30 + $0xa] sm:$0xff]  ;;  %v3297_v25 = vld [vmem:[%s3204_s30 + $0x18] sm:$0xff] }
  0x1c   : > { %2831 = vmatmul.mubr.msk.f32.gmra.mxu1 %vm234_vm1, %v3238_v12  ;;  %2821 = vmatprep.mubr.msk.f32.mxu0 %vm234_vm1, %v3245_v13  ;;  %v200_v23 = vld [vmem:[%s3204_s30 + $0x8] sm:$0xff]  ;;  %v202_v29 = vld [vmem:[%s3204_s30 + $0x20] sm:$0xff]  ;;  %v3325_v31 = vld [vmem:[%s3204_s30 + $0x30] sm:$0xff] }
  0x1d   : > { %2833 = vmatprep.mubr.msk.f32.mxu1 %vm234_vm1, %v3248_v14  ;;  %v3318_v30 = vld [vmem:[%s3204_s30 + $0x22] sm:$0xff]  ;;  %v3328_v32 = vld [vmem:[%s3204_s30 + $0x32] sm:$0xff]  ;;  %v3345_v34 = vld [vmem:[%s3204_s30 + $0x3a] sm:$0xff] }
  0x1e   : > { %v3342_v33 = vld [vmem:[%s3204_s30 + $0x38] sm:$0xff]  ;;  %v3348_v35 = vld [vmem:[%s3204_s30 + $0x48] sm:$0xff]  ;;  %v3362_v37 = vld [vmem:[%s3204_s30 + $0x50] sm:$0xff] }
  0x1f   : > { %2822 = vmatmul.mubr.msk.f32.gmra.mxu0 %vm234_vm1, %v3261_v15  ;;  %v3351_v36 = vld [vmem:[%s3204_s30 + $0x4a] sm:$0xff]  ;;  %v3365_v38 = vld [vmem:[%s3204_s30 + $0x52] sm:$0xff]  ;;  %v3368_v39 = vld [vmem:[%s3204_s30 + $0x60] sm:$0xff] }
  0x20   : > { %2834 = vmatmul.mubr.msk.f32.gmra.mxu1 %vm234_vm1, %v3264_v16  ;;  %2824 = vmatprep.mubr.msk.f32.mxu0 %vm234_vm1, %v3267_v17  ;;  %v3371_v40 = vld [vmem:[%s3204_s30 + $0x62] sm:$0xff]  ;;  %v3385_v42 = vld [vmem:[%s3204_s30 + $0x6a] sm:$0xff]  ;;  %v3388_v43 = vld [vmem:[%s3204_s30 + $0x78] sm:$0xff] }
  0x21   : > { %2836 = vmatprep.mubr.msk.f32.mxu1 %vm234_vm1, %v3270_v18  ;;  %v3382_v41 = vld [vmem:[%s3204_s30 + $0x68] sm:$0xff]  ;;  %v3391_v44 = vld [vmem:[%s3204_s30 + $0x7a] sm:$0xff]  ;;  %v3408_v47 = vld [vmem:[%s3204_s30 + $0x90] sm:$0xff] }
  0x22   : > { %v3402_v45 = vld [vmem:[%s3204_s30 + $0x80] sm:$0xff]  ;;  %v3411_v48 = vld [vmem:[%s3204_s30 + $0x92] sm:$0xff]  ;;  %v3428_v51 = vld [vmem:[%s3204_s30 + $0xa8] sm:$0xff] }
  0x23   : > { %2825 = vmatmul.mubr.msk.f32.gmra.mxu0 %vm234_vm1, %v3281_v19  ;;  %v3405_v46 = vld [vmem:[%s3204_s30 + $0x82] sm:$0xff]  ;;  %v3422_v49 = vld [vmem:[%s3204_s30 + $0x98] sm:$0xff]  ;;  %v3431_v52 = vld [vmem:[%s3204_s30 + $0xaa] sm:$0xff] }
  0x24   : > { %2837 = vmatmul.mubr.msk.f32.gmra.mxu1 %vm234_vm1, %v3284_v20  ;;  %2867 = vmatprep.mubr.msk.f32.mxu0 %vm234_vm1, %v628_v22  ;;  %v3425_v50 = vld [vmem:[%s3204_s30 + $0x9a] sm:$0xff]  ;;  %v3442_v53 = vld [vmem:[%s3204_s30 + $0xb0] sm:$0xff]  ;;  %v2466_v59 = vld [vmem:[%s3204_s30 + $0xc8] sm:$0xff] }
  0x25   : > { %2841 = vmatprep.mubr.msk.f32.mxu1 %vm234_vm1, %v199_v21  ;;  %v3445_v54 = vld [vmem:[%s3204_s30 + $0xb2] sm:$0xff]  ;;  %v2465_v57 = vld [vmem:[%s3204_s30 + $0xc0] sm:$0xff]  ;;  %v3527_v60 = vld [vmem:[%s3204_s30 + $0xc9] sm:$0xff] }
  0x26   : > { %v3516_v58 = vld [vmem:[%s3204_s30 + $0xc1] sm:$0xff]  ;;  %v2569_v62 = vld [vmem:[%s3204_s30 + $0xd8] sm:$0xff]  ;;  %v2534_v63 = vld [vmem:[%s3204_s30 + $0xca] sm:$0xff] }
  0x27   : > { %2868 = vmatmul.mubr.msk.f32.vlgmr.msra.gmra.mxu0 %vm234_vm1, %v629_v24  ;;  %v2533_v61 = vld [vmem:[%s3204_s30 + $0xc2] sm:$0xff]  ;;  %v2603_v1 = vld [vmem:[%s3204_s30 + $0xd9] sm:$0xff] }
  0x28   : > { %2842 = vmatmul.mubr.msk.f32.vlgmr.msra.gmra.mxu1 %vm234_vm1, %v200_v23  ;;  %2918 = vmatpush3.msk.msra.mxu0 %vm283_vm0, %v2501_v10  ;;  %v2570_v0 = vld [vmem:[%s3204_s30 + $0xe0] sm:$0xff] }
  0x29   : > { %2892 = vmatpush3.msk.msra.mxu1 %vm283_vm0, %v2467_v9  ;;  %2844 = vmatprep.mubr.msk.f32.mxu1 %vm234_vm1, %v3297_v25  ;;  %v2637_v2 = vld [vmem:[%s3204_s30 + $0xda] sm:$0xff] }
  0x2a   : > { %2870 = vmatprep.mubr.msk.f32.mxu0 %vm234_vm1, %v3300_v26  ;;  %2943 = vmatprep.subr.msk.mxu1 %vm283_vm0, %v3307_v27  ;;  %v2604_v3 = vld [vmem:[%s3204_s30 + $0xe1] sm:$0xff] }
  0x2b   : > { %2969 = vmatprep.subr.msk.mxu0 %vm283_vm0, %v3312_v28  ;;  %2871 = vmatmul.mubr.msk.f32.gmra.mxu0 %vm234_vm1, %v3318_v30 }
  0x2c   : > { %2845 = vmatmul.mubr.msk.f32.gmra.mxu1 %vm234_vm1, %v202_v29  ;;  %2873 = vmatprep.mubr.msk.f32.mxu0 %vm234_vm1, %v3328_v32 }
  0x2d   : > { %2847 = vmatprep.mubr.msk.f32.mxu1 %vm234_vm1, %v3325_v31 }
  0x2f   : > { %2874 = vmatmul.mubr.msk.f32.gmra.mxu0 %vm234_vm1, %v3345_v34 }
  0x30   : > { %2848 = vmatmul.mubr.msk.f32.gmra.mxu1 %vm234_vm1, %v3342_v33  ;;  %2876 = vmatprep.mubr.msk.f32.mxu0 %vm234_vm1, %v3351_v36 }
  0x31   : > { %2850 = vmatprep.mubr.msk.f32.mxu1 %vm234_vm1, %v3348_v35 }
  0x33   : > { %2877 = vmatmul.mubr.msk.f32.gmra.mxu0 %vm234_vm1, %v3365_v38 }
  0x34   : > { %2851 = vmatmul.mubr.msk.f32.gmra.mxu1 %vm234_vm1, %v3362_v37  ;;  %2879 = vmatprep.mubr.msk.f32.mxu0 %vm234_vm1, %v3371_v40 }
  0x35   : > { %2853 = vmatprep.mubr.msk.f32.mxu1 %vm234_vm1, %v3368_v39 }
  0x37   : > { %2880 = vmatmul.mubr.msk.f32.gmra.mxu0 %vm234_vm1, %v3385_v42 }
  0x38   : > { %2854 = vmatmul.mubr.msk.f32.gmra.mxu1 %vm234_vm1, %v3382_v41  ;;  %2882 = vmatprep.mubr.msk.f32.mxu0 %vm234_vm1, %v3391_v44 }
  0x39   : > { %2856 = vmatprep.mubr.msk.f32.mxu1 %vm234_vm1, %v3388_v43 }
  0x3b   : > { %2883 = vmatmul.mubr.msk.f32.gmra.mxu0 %vm234_vm1, %v3405_v46 }
  0x3c   : > { %2857 = vmatmul.mubr.msk.f32.gmra.mxu1 %vm234_vm1, %v3402_v45  ;;  %2885 = vmatprep.mubr.msk.f32.mxu0 %vm234_vm1, %v3411_v48 }
  0x3d   : > { %2859 = vmatprep.mubr.msk.f32.mxu1 %vm234_vm1, %v3408_v47 }
  0x3f   : > { %2886 = vmatmul.mubr.msk.f32.gmra.mxu0 %vm234_vm1, %v3425_v50 }
  0x40   : > { %2860 = vmatmul.mubr.msk.f32.gmra.mxu1 %vm234_vm1, %v3422_v49  ;;  %2888 = vmatprep.mubr.msk.f32.mxu0 %vm234_vm1, %v3431_v52 }
  0x41   : > { %2862 = vmatprep.mubr.msk.f32.mxu1 %vm234_vm1, %v3428_v51 }
  0x43   : > { %2889 = vmatmul.mubr.msk.f32.gmra.mxu0 %vm234_vm1, %v3445_v54 }
  0x44   : > { %2863 = vmatmul.mubr.msk.f32.gmra.mxu1 %vm234_vm1, %v3442_v53  ;;  %2919 = vmatprep.mubr.msk.f32.mxu0 %vm234_vm1, %v3218_v7 }
  0x45   : > { %2893 = vmatprep.mubr.msk.f32.mxu1 %vm234_vm1, %v3297_v25 }
  0x47   : > { %2920 = vmatmul.mubr.msk.f32.vlgmr.msra.gmra.mxu0 %vm234_vm1, %v3235_v11 }
  0x48   : > { %2894 = vmatmul.mubr.msk.f32.vlgmr.msra.gmra.mxu1 %vm234_vm1, %v202_v29  ;;  %2970 = vmatpush3.msk.msra.mxu0 %vm283_vm0, %v3312_v28 }
  0x49   : > { %2944 = vmatpush3.msk.msra.mxu1 %vm283_vm0, %v3307_v27  ;;  %2896 = vmatprep.mubr.msk.f32.mxu1 %vm234_vm1, %v3325_v31 }
  0x4a   : > { %2922 = vmatprep.mubr.msk.f32.mxu0 %vm234_vm1, %v3245_v13  ;;  %2995 = vmatprep.subr.msk.mxu1 %vm283_vm0, %v2605_v55 }
  0x4b   : > { %3021 = vmatprep.subr.msk.mxu0 %vm283_vm0, %v2639_v56  ;;  %2923 = vmatmul.mubr.msk.f32.gmra.mxu0 %vm234_vm1, %v3261_v15 }
  0x4c   : > { %2897 = vmatmul.mubr.msk.f32.gmra.mxu1 %vm234_vm1, %v3342_v33  ;;  %2925 = vmatprep.mubr.msk.f32.mxu0 %vm234_vm1, %v3267_v17 }
  0x4d   : > { %2899 = vmatprep.mubr.msk.f32.mxu1 %vm234_vm1, %v3348_v35 }
  0x4f   : > { %2926 = vmatmul.mubr.msk.f32.gmra.mxu0 %vm234_vm1, %v3281_v19 }
  0x50   : > { %2900 = vmatmul.mubr.msk.f32.gmra.mxu1 %vm234_vm1, %v3362_v37  ;;  %2928 = vmatprep.mubr.msk.f32.mxu0 %vm234_vm1, %v3208_v4 }
  0x51   : > { %2902 = vmatprep.mubr.msk.f32.mxu1 %vm234_vm1, %v3368_v39 }
  0x53   : > { %2929 = vmatmul.mubr.msk.f32.gmra.mxu0 %vm234_vm1, %v3215_v6 }
  0x54   : > { %2903 = vmatmul.mubr.msk.f32.gmra.mxu1 %vm234_vm1, %v3382_v41  ;;  %2931 = vmatprep.mubr.msk.f32.mxu0 %vm234_vm1, %v3221_v8 }
  0x55   : > { %2905 = vmatprep.mubr.msk.f32.mxu1 %vm234_vm1, %v3388_v43 }
  0x57   : > { %2932 = vmatmul.mubr.msk.f32.gmra.mxu0 %vm234_vm1, %v3238_v12 }
  0x58   : > { %2906 = vmatmul.mubr.msk.f32.gmra.mxu1 %vm234_vm1, %v3402_v45  ;;  %2934 = vmatprep.mubr.msk.f32.mxu0 %vm234_vm1, %v3248_v14 }
  0x59   : > { %2908 = vmatprep.mubr.msk.f32.mxu1 %vm234_vm1, %v3408_v47 }
  0x5b   : > { %2935 = vmatmul.mubr.msk.f32.gmra.mxu0 %vm234_vm1, %v3264_v16 }
  0x5c   : > { %2909 = vmatmul.mubr.msk.f32.gmra.mxu1 %vm234_vm1, %v3422_v49  ;;  %2937 = vmatprep.mubr.msk.f32.mxu0 %vm234_vm1, %v3270_v18 }
  0x5d   : > { %2911 = vmatprep.mubr.msk.f32.mxu1 %vm234_vm1, %v3428_v51 }
  0x5f   : > { %2938 = vmatmul.mubr.msk.f32.gmra.mxu0 %vm234_vm1, %v3284_v20 }
  0x60   : > { %2912 = vmatmul.mubr.msk.f32.gmra.mxu1 %vm234_vm1, %v3442_v53  ;;  %2940 = vmatprep.mubr.msk.f32.mxu0 %vm234_vm1, %v3516_v58 }
  0x61   : > { %2914 = vmatprep.mubr.msk.f32.mxu1 %vm234_vm1, %v2465_v57 }
  0x63   : > { %2941 = vmatmul.mubr.msk.f32.gmra.mxu0 %vm234_vm1, %v3527_v60 }
  0x64   : > { %2915 = vmatmul.mubr.msk.f32.gmra.mxu1 %vm234_vm1, %v2466_v59  ;;  %2971 = vmatprep.mubr.msk.f32.mxu0 %vm234_vm1, %v3325_v31 }
  0x65   : > { %2945 = vmatprep.mubr.msk.f32.mxu1 %vm234_vm1, %v3300_v26 }
  0x67   : > { %2972 = vmatmul.mubr.msk.f32.vlgmr.msra.gmra.mxu0 %vm234_vm1, %v3342_v33 }
  0x68   : > { %2946 = vmatmul.mubr.msk.f32.vlgmr.msra.gmra.mxu1 %vm234_vm1, %v3318_v30  ;;  %3022 = vmatpush3.msk.msra.mxu0 %vm283_vm0, %v2639_v56 }
  0x69   : > { %2996 = vmatpush3.msk.msra.mxu1 %vm283_vm0, %v2605_v55  ;;  %2948 = vmatprep.mubr.msk.f32.mxu1 %vm234_vm1, %v3328_v32 }
  0x6a   : > { %2974 = vmatprep.mubr.msk.f32.mxu0 %vm234_vm1, %v3348_v35 }
  0x6b   : > { %2975 = vmatmul.mubr.msk.f32.gmra.mxu0 %vm234_vm1, %v3362_v37 }
  0x6c   : > { %2949 = vmatmul.mubr.msk.f32.gmra.mxu1 %vm234_vm1, %v3345_v34  ;;  %2977 = vmatprep.mubr.msk.f32.mxu0 %vm234_vm1, %v3368_v39 }
  0x6d   : > { %2951 = vmatprep.mubr.msk.f32.mxu1 %vm234_vm1, %v3351_v36 }
  0x6f   : > { %2978 = vmatmul.mubr.msk.f32.gmra.mxu0 %vm234_vm1, %v3382_v41 }
  0x70   : > { %2952 = vmatmul.mubr.msk.f32.gmra.mxu1 %vm234_vm1, %v3365_v38  ;;  %2980 = vmatprep.mubr.msk.f32.mxu0 %vm234_vm1, %v3388_v43 }
  0x71   : > { %2954 = vmatprep.mubr.msk.f32.mxu1 %vm234_vm1, %v3371_v40 }
  0x73   : > { %2981 = vmatmul.mubr.msk.f32.gmra.mxu0 %vm234_vm1, %v3402_v45 }
  0x74   : > { %2955 = vmatmul.mubr.msk.f32.gmra.mxu1 %vm234_vm1, %v3385_v42  ;;  %2983 = vmatprep.mubr.msk.f32.mxu0 %vm234_vm1, %v3408_v47 }
  0x75   : > { %2957 = vmatprep.mubr.msk.f32.mxu1 %vm234_vm1, %v3391_v44 }
  0x77   : > { %2984 = vmatmul.mubr.msk.f32.gmra.mxu0 %vm234_vm1, %v3422_v49 }
  0x78   : > { %2958 = vmatmul.mubr.msk.f32.gmra.mxu1 %vm234_vm1, %v3405_v46  ;;  %2986 = vmatprep.mubr.msk.f32.mxu0 %vm234_vm1, %v3428_v51 }
  0x79   : > { %2960 = vmatprep.mubr.msk.f32.mxu1 %vm234_vm1, %v3411_v48 }
  0x7b   : > { %2987 = vmatmul.mubr.msk.f32.gmra.mxu0 %vm234_vm1, %v3442_v53 }
  0x7c   : > { %2961 = vmatmul.mubr.msk.f32.gmra.mxu1 %vm234_vm1, %v3425_v50  ;;  %2989 = vmatprep.mubr.msk.f32.mxu0 %vm234_vm1, %v2465_v57 }
  0x7d   : > { %2963 = vmatprep.mubr.msk.f32.mxu1 %vm234_vm1, %v3431_v52 }
  0x7f   : > { %2990 = vmatmul.mubr.msk.f32.gmra.mxu0 %vm234_vm1, %v2466_v59 }
  0x80   : > { %2964 = vmatmul.mubr.msk.f32.gmra.mxu1 %vm234_vm1, %v3445_v54  ;;  %2992 = vmatprep.mubr.msk.f32.mxu0 %vm234_vm1, %v2569_v62 }
  0x81   : > { %2966 = vmatprep.mubr.msk.f32.mxu1 %vm234_vm1, %v2533_v61 }
  0x83   : > { %2993 = vmatmul.mubr.msk.f32.gmra.mxu0 %vm234_vm1, %v2570_v0 }
  0x84   : > { %2967 = vmatmul.mubr.msk.f32.gmra.mxu1 %vm234_vm1, %v2534_v63  ;;  %3023 = vmatprep.mubr.msk.f32.mxu0 %vm234_vm1, %v3328_v32 }
  0x85   : > { %2997 = vmatprep.mubr.msk.f32.mxu1 %vm234_vm1, %v3245_v13 }
  0x87   : > { %3024 = vmatmul.mubr.msk.f32.vlgmr.msra.gmra.mxu0 %vm234_vm1, %v3345_v34 }
  0x88   : > { %2998 = vmatmul.mubr.msk.f32.vlgmr.msra.gmra.mxu1 %vm234_vm1, %v3261_v15  ;;  %3026 = vmatprep.mubr.msk.f32.mxu0 %vm234_vm1, %v3351_v36 }
  0x89   : > { %3000 = vmatprep.mubr.msk.f32.mxu1 %vm234_vm1, %v3267_v17 }
  0x8b   : > { %3027 = vmatmul.mubr.msk.f32.gmra.mxu0 %vm234_vm1, %v3365_v38 }
  0x8c   : > { %3001 = vmatmul.mubr.msk.f32.gmra.mxu1 %vm234_vm1, %v3281_v19  ;;  %3029 = vmatprep.mubr.msk.f32.mxu0 %vm234_vm1, %v3371_v40 }
  0x8d   : > { %3003 = vmatprep.mubr.msk.f32.mxu1 %vm234_vm1, %v3208_v4  ;;  %v2638_v4 = vld [vmem:[%s3204_s30 + $0xe2] sm:$0xff]  ;;  %s3826_s30 = scalar_lea.vmem %s3940_s3, %s2393_s13 }
  0x8f   : > { %3030 = vmatmul.mubr.msk.f32.gmra.mxu0 %vm234_vm1, %v3385_v42 }
  0x90   : > { %3004 = vmatmul.mubr.msk.f32.gmra.mxu1 %vm234_vm1, %v3215_v6  ;;  %3032 = vmatprep.mubr.msk.f32.mxu0 %vm234_vm1, %v3391_v44 }
  0x91   : > { %3006 = vmatprep.mubr.msk.f32.mxu1 %vm234_vm1, %v3221_v8 }
  0x93   : > { %3033 = vmatmul.mubr.msk.f32.gmra.mxu0 %vm234_vm1, %v3405_v46 }
  0x94   : > { %3007 = vmatmul.mubr.msk.f32.gmra.mxu1 %vm234_vm1, %v3238_v12  ;;  %3035 = vmatprep.mubr.msk.f32.mxu0 %vm234_vm1, %v3411_v48 }
  0x95   : > { %3009 = vmatprep.mubr.msk.f32.mxu1 %vm234_vm1, %v3248_v14 }
  0x97   : > { %3036 = vmatmul.mubr.msk.f32.gmra.mxu0 %vm234_vm1, %v3425_v50 }
  0x98   : > { %3010 = vmatmul.mubr.msk.f32.gmra.mxu1 %vm234_vm1, %v3264_v16  ;;  %3038 = vmatprep.mubr.msk.f32.mxu0 %vm234_vm1, %v3431_v52 }
  0x99   : > { %3012 = vmatprep.mubr.msk.f32.mxu1 %vm234_vm1, %v3270_v18 }
  0x9b   : > { %3039 = vmatmul.mubr.msk.f32.gmra.mxu0 %vm234_vm1, %v3445_v54 }
  0x9c   : > { %3013 = vmatmul.mubr.msk.f32.gmra.mxu1 %vm234_vm1, %v3284_v20  ;;  %3041 = vmatprep.mubr.msk.f32.mxu0 %vm234_vm1, %v2533_v61 }
  0x9d   : > { %3015 = vmatprep.mubr.msk.f32.mxu1 %vm234_vm1, %v3516_v58 }
  0x9f   : > { %3042 = vmatmul.mubr.msk.f32.gmra.mxu0 %vm234_vm1, %v2534_v63 }
  0xa0   : > { %3016 = vmatmul.mubr.msk.f32.gmra.mxu1 %vm234_vm1, %v3527_v60  ;;  %3044 = vmatprep.mubr.msk.f32.mxu0 %vm234_vm1, %v2637_v2 }
  0xa1   : > { %3018 = vmatprep.mubr.msk.f32.mxu1 %vm234_vm1, %v2603_v1 }
  0xa3   : > { %3045 = vmatmul.mubr.msk.f32.gmra.mxu0 %vm234_vm1, %v2638_v4 }
  0xa4   : > { %3019 = vmatmul.mubr.msk.f32.gmra.mxu1 %vm234_vm1, %v2604_v3 }
  0xd7   : > { %v2817_v5 = vpop.f32.mrf.mxu0 }
  0xd8   : > { %v2829_v6 = vpop.f32.mrf.mxu1 }
  0xd9   : > { %v353_v7 = vpop.f32.mrf.mxu0 }
  0xda   : > { %v393_v8 = vpop.f32.mrf.mxu1 }
  0xdb   : > { %v2820_v9 = vpop.f32.mrf.mxu0 }
  0xdc   : > { %v2832_v10 = vpop.f32.mrf.mxu1 }
  0xdd   : > { %v363_v11 = vpop.f32.mrf.mxu0 }
  0xde   : > { %v403_v12 = vpop.f32.mrf.mxu1 }
  0xdf   : > { %v2823_v13 = vpop.f32.mrf.mxu0 }
  0xe0   : > { %v2835_v14 = vpop.f32.mrf.mxu1 }
  0xe1   : > { %v373_v15 = vpop.f32.mrf.mxu0 }
  0xe2   : > { %v413_v16 = vpop.f32.mrf.mxu1 }
  0xe3   : > { %v2826_v17 = vpop.f32.mrf.mxu0 }
  0xe4   : > { %v2838_v18 = vpop.f32.mrf.mxu1 }
  0xe5   : > { %v383_v19 = vpop.f32.mrf.mxu0 }
  0xe6   : > { %v3658_v20 = vpop.f32.mrf.mxu1 }
  0xe7   : > { %v2869_v22 = vpop.f32.mrf.mxu0 }
  0xe8   : > { %v2843_v21 = vpop.f32.mrf.mxu1 }
  0xe9   : > { %v555_v23 = vadd.f32 %v2843_v21, %v2817_v5  ;;  %v763_v25 = vpop.f32.mrf.mxu0 }
  0xea   : > { %v549_v24 = vpop.f32.mrf.mxu1 }
  0xeb   : > { %v3660_v26 = vadd.f32 %v2869_v22, %v555_v23  ;;  %v550_v27 = vadd.f32 %v549_v24, %v353_v7  ;;  %v2872_v29 = vpop.f32.mrf.mxu0 }
  0xec   : > { %v2846_v28 = vpop.f32.mrf.mxu1 }
  0xed   : > { %v3662_v30 = vadd.f32 %v763_v25, %v550_v27  ;;  %v565_v31 = vadd.f32 %v2846_v28, %v2820_v9  ;;  %v773_v33 = vpop.f32.mrf.mxu0 }
  0xee   : > { %v559_v32 = vpop.f32.mrf.mxu1 }
  0xef   : > { %v3664_v34 = vadd.f32 %v2872_v29, %v565_v31  ;;  %v560_v35 = vadd.f32 %v559_v32, %v363_v11  ;;  %v2875_v37 = vpop.f32.mrf.mxu0 }
  0xf0   : > { %v2849_v36 = vpop.f32.mrf.mxu1 }
  0xf1   : > { %v3666_v38 = vadd.f32 %v773_v33, %v560_v35  ;;  %v575_v39 = vadd.f32 %v2849_v36, %v2823_v13  ;;  %v783_v41 = vpop.f32.mrf.mxu0 }
  0xf2   : > { %v569_v40 = vpop.f32.mrf.mxu1 }
  0xf3   : > { %v3668_v42 = vadd.f32 %v2875_v37, %v575_v39  ;;  %v570_v43 = vadd.f32 %v569_v40, %v373_v15  ;;  %v2878_v45 = vpop.f32.mrf.mxu0 }
  0xf4   : > { %v2852_v44 = vpop.f32.mrf.mxu1 }
  0xf5   : > { %v3670_v46 = vadd.f32 %v783_v41, %v570_v43  ;;  %v585_v47 = vadd.f32 %v2852_v44, %v2826_v17  ;;  %v793_v49 = vpop.f32.mrf.mxu0 }
  0xf6   : > { %v579_v48 = vpop.f32.mrf.mxu1 }
  0xf7   : > { %v3672_v50 = vadd.f32 %v2878_v45, %v585_v47  ;;  %v580_v51 = vadd.f32 %v579_v48, %v383_v19  ;;  %v2881_v53 = vpop.f32.mrf.mxu0 }
  0xf8   : > { %v2855_v52 = vpop.f32.mrf.mxu1 }
  0xf9   : > { %v3674_v54 = vadd.f32 %v793_v49, %v580_v51  ;;  %v595_v55 = vadd.f32 %v2855_v52, %v2829_v6  ;;  %v803_v57 = vpop.f32.mrf.mxu0 }
  0xfa   : > { %v589_v56 = vpop.f32.mrf.mxu1 }
  0xfb   : > { %v3676_v58 = vadd.f32 %v2881_v53, %v595_v55  ;;  %v590_v59 = vadd.f32 %v589_v56, %v393_v8  ;;  %v2884_v61 = vpop.f32.mrf.mxu0 }
  0xfc   : > { %v2858_v60 = vpop.f32.mrf.mxu1 }
  0xfd   : > { %v3678_v62 = vadd.f32 %v803_v57, %v590_v59  ;;  %v605_v63 = vadd.f32 %v2858_v60, %v2832_v10  ;;  %v813_v1 = vpop.f32.mrf.mxu0 }
  0xfe   : > { %v599_v0 = vpop.f32.mrf.mxu1 }
  0xff   : > { %v3680_v2 = vadd.f32 %v2884_v61, %v605_v63  ;;  %v600_v3 = vadd.f32 %v599_v0, %v403_v12  ;;  %v2887_v5 = vpop.f32.mrf.mxu0 }
 0x100   : > { %v2861_v4 = vpop.f32.mrf.mxu1 }
 0x101   : > { %v3682_v7 = vadd.f32 %v813_v1, %v600_v3  ;;  %v615_v6 = vadd.f32 %v2861_v4, %v2835_v14  ;;  %v823_v11 = vpop.f32.mrf.mxu0 }
 0x102   : > { %v609_v9 = vpop.f32.mrf.mxu1 }
 0x103   : > { %v3684_v13 = vadd.f32 %v2887_v5, %v615_v6  ;;  %v610_v8 = vadd.f32 %v609_v9, %v413_v16  ;;  %v2890_v17 = vpop.f32.mrf.mxu0 }
 0x104   : > { %v2864_v15 = vpop.f32.mrf.mxu1 }
 0x105   : > { %v3686_v19 = vadd.f32 %v823_v11, %v610_v8  ;;  %v625_v10 = vadd.f32 %v2864_v15, %v2838_v18  ;;  %v833_v22 = vpop.f32.mrf.mxu0 }
 0x106   : > { %v619_v21 = vpop.f32.mrf.mxu1 }
 0x107   : > { %3941 = vst [vmem:[#allocation2_spill] sm:$0xff] %v3686_v19  ;;  %v3688_v23 = vadd.f32 %v2890_v17, %v625_v10  ;;  %v620_v12 = vadd.f32 %v619_v21, %v3658_v20  ;;  %v3691_v25 = vpop.f32.mrf.mxu0 }
 0x108   : > { %v2895_v24 = vpop.f32.mrf.mxu1 }
 0x109   : > { %3942 = vst [vmem:[#allocation3_spill] sm:$0xff] %v3688_v23  ;;  %v3693_v14 = vadd.f32 %v833_v22, %v620_v12  ;;  %v3695_v28 = vpop.f32.mrf.mxu0  ;;  %v1076_v23 = vadd.f32 %v2895_v24, %v3660_v26 }
 0x10a   : > { %v996_v27 = vpop.f32.mrf.mxu1 }
 0x10b   : > { %3943 = vst [vmem:[#allocation4_spill] sm:$0xff] %v3693_v14  ;;  %v3697_v29 = vpop.f32.mrf.mxu0  ;;  %v1075_v19 = vadd.f32 %v996_v27, %v3662_v30 }
 0x10c   : > { %v2898_v16 = vpop.f32.mrf.mxu1 }
 0x10d   : > { %v3699_v32 = vpop.f32.mrf.mxu0  ;;  %v1305_v26 = vadd.f32 %v3695_v28, %v1075_v19 }
 0x10e   : > { %v1006_v31 = vpop.f32.mrf.mxu1 }
 0x10f   : > { %v3703_v33 = vpop.f32.mrf.mxu0  ;;  %v1077_v24 = vadd.f32 %v1006_v31, %v3666_v38 }
 0x110   : > { %v3701_v18 = vpop.f32.mrf.mxu1 }
 0x111   : > { %v3707_v20 = vpop.f32.mrf.mxu0  ;;  %v1080_v30 = vadd.f32 %v3701_v18, %v3668_v42  ;;  %v1307_v38 = vadd.f32 %v3699_v32, %v1077_v24  ;;  %v3818_v32 = vld [vmem:[%s3939_s2] ss:$0 sm:$0xff] }
 0x112   : > { %v3705_v35 = vpop.f32.mrf.mxu1 }
 0x113   : > { %v3711_v37 = vpop.f32.mrf.mxu0  ;;  %v1310_v42 = vadd.f32 %v3703_v33, %v1080_v30 }
 0x114   : > { %v3709_v36 = vpop.f32.mrf.mxu1 }
 0x115   : > { %v3715_v40 = vpop.f32.mrf.mxu0  ;;  %v1082_v31 = vadd.f32 %v3709_v36, %v3672_v50 }
 0x116   : > { %v3713_v39 = vpop.f32.mrf.mxu1 }
 0x117   : > { %v3719_v43 = vpop.f32.mrf.mxu0 }
 0x118   : > { %v3717_v41 = vpop.f32.mrf.mxu1 }
 0x119   : > { %v3723_v45 = vpop.f32.mrf.mxu0 }
 0x11a   : > { %v3721_v44 = vpop.f32.mrf.mxu1 }
 0x11b   : > { %v3727_v48 = vpop.f32.mrf.mxu0 }
 0x11c   : > { %v3725_v47 = vpop.f32.mrf.mxu1 }
 0x11d   : > { %v3731_v51 = vpop.f32.mrf.mxu0 }
 0x11e   : > { %v3729_v49 = vpop.f32.mrf.mxu1  ;;  %3944 = vst [vmem:[#allocation5_spill] sm:$0xff] %v3731_v51 }
 0x11f   : > { %v3735_v53 = vpop.f32.mrf.mxu0 }
 0x120   : > { %v3733_v52 = vpop.f32.mrf.mxu1  ;;  %3945 = vst [vmem:[#allocation6_spill] sm:$0xff] %v3735_v53 }
 0x121   : > { %v3739_v56 = vpop.f32.mrf.mxu0 }
 0x122   : > { %v3737_v55 = vpop.f32.mrf.mxu1  ;;  %3947 = vst [vmem:[#allocation8_spill] sm:$0xff] %v3739_v56 }
 0x123   : > { %3946 = vst [vmem:[#allocation7_spill] sm:$0xff] %v3737_v55  ;;  %v3743_v59 = vpop.f32.mrf.mxu0 }
 0x124   : > { %v3741_v57 = vpop.f32.mrf.mxu1  ;;  %3949 = vst [vmem:[#allocation10_spill] sm:$0xff] %v3743_v59 }
 0x125   : > { %3948 = vst [vmem:[#allocation9_spill] sm:$0xff] %v3741_v57  ;;  %v3747_v61 = vpop.f32.mrf.mxu0 }
 0x126   : > { %v3745_v60 = vpop.f32.mrf.mxu1  ;;  %3951 = vst [vmem:[#allocation12_spill] sm:$0xff] %v3747_v61 }
 0x127   : > { %3950 = vst [vmem:[#allocation11_spill] sm:$0xff] %v3745_v60  ;;  %v2973_v0 = vpop.f32.mrf.mxu0 }
 0x128   : > { %v2947_v63 = vpop.f32.mrf.mxu1 }
 0x129   : > { %v1689_v3 = vpop.f32.mrf.mxu0 }
 0x12a   : > { %v1456_v1 = vpop.f32.mrf.mxu1 }
 0x12b   : > { %v2976_v5 = vpop.f32.mrf.mxu0 }
 0x12c   : > { %v2950_v4 = vpop.f32.mrf.mxu1 }
 0x12d   : > { %v3749_v9 = vpop.f32.mrf.mxu0 }
 0x12e   : > { %v1466_v6 = vpop.f32.mrf.mxu1 }
 0x12f   : > { %v3751_v8 = vpop.f32.mrf.mxu0 }
 0x130   : > { %v2953_v11 = vpop.f32.mrf.mxu1 }
 0x131   : > { %v3753_v17 = vpop.f32.mrf.mxu0 }
 0x132   : > { %v1476_v15 = vpop.f32.mrf.mxu1 }
 0x133   : > { %v3757_v21 = vpop.f32.mrf.mxu0 }
 0x134   : > { %v3755_v10 = vpop.f32.mrf.mxu1 }
 0x135   : > { %v3761_v12 = vpop.f32.mrf.mxu0 }
 0x136   : > { %v3759_v22 = vpop.f32.mrf.mxu1  ;;  %3952 = vst [vmem:[#allocation13_spill] sm:$0xff] %v3761_v12 }
 0x137   : > { %v3765_v59 = vpop.f32.mrf.mxu0 }
 0x138   : > { %v3763_v61 = vpop.f32.mrf.mxu1  ;;  %3953 = vst [vmem:[#allocation14_spill] sm:$0xff] %v3765_v59 }
 0x139   : > { %v3770_v14 = vpop.f32.mrf.mxu0 }
 0x13a   : > { %v3768_v60 = vpop.f32.mrf.mxu1  ;;  %3954 = vst [vmem:[#allocation15_spill] sm:$0xff] %v3770_v14  ;;  %v1306_v14 = vadd.f32 %v3691_v25, %v1076_v23  ;;  %v1535_v23 = vadd.f32 %v1456_v1, %v1305_v26  ;;  %v1079_v25 = vadd.f32 %v3705_v35, %v3670_v46  ;;  %v1081_v35 = vadd.f32 %v3713_v39, %v3674_v54 }
 0x13b   : > { %v3774_v57 = vpop.f32.mrf.mxu0  ;;  %v1540_v26 = vadd.f32 %v2953_v11, %v1310_v42 }
 0x13c   : > { %v3772_v56 = vpop.f32.mrf.mxu1  ;;  %3956 = vst [vmem:[#allocation17_spill] sm:$0xff] %v3774_v57  ;;  %v1309_v46 = vadd.f32 %v3707_v20, %v1079_v25 }
 0x13d   : > { %3955 = vst [vmem:[#allocation16_spill] sm:$0xff] %v3772_v56  ;;  %v3779_v55 = vpop.f32.mrf.mxu0  ;;  %v1078_v56 = vadd.f32 %v2898_v16, %v3664_v34 }
 0x13e   : > { %v3777_v53 = vpop.f32.mrf.mxu1  ;;  %3957 = vst [vmem:[#allocation18_spill] sm:$0xff] %v3779_v55  ;;  %v1536_v55 = vadd.f32 %v2947_v63, %v1306_v14  ;;  %v1537_v63 = vadd.f32 %v1466_v6, %v1307_v38  ;;  %v1539_v20 = vadd.f32 %v1476_v15, %v1309_v46 }
 0x13f   : > { %v3784_v51 = vpop.f32.mrf.mxu0  ;;  %v1308_v34 = vadd.f32 %v3697_v29, %v1078_v56  ;;  %v1768_v56 = vadd.f32 %v1689_v3, %v1535_v23  ;;  %v1312_v3 = vadd.f32 %v3711_v37, %v1082_v31  ;;  %v1311_v37 = vadd.f32 %v3715_v40, %v1081_v35 }
 0x140   : > { %v3782_v59 = vpop.f32.mrf.mxu1  ;;  %3958 = vst [vmem:[#allocation19_spill] sm:$0xff] %v3784_v51  ;;  %v1769_v14 = vadd.f32 %v2973_v0, %v1536_v55  ;;  %v1770_v6 = vadd.f32 %v3749_v9, %v1537_v63  ;;  %v1086_v40 = vadd.f32 %v3725_v47, %v3680_v2 }
 0x141   : > { %v3790_v57 = vpop.f32.mrf.mxu0  ;;  %v1538_v28 = vadd.f32 %v2950_v4, %v1308_v34  ;;  %v1084_v4 = vadd.f32 %v3717_v41, %v3676_v58  ;;  %v1083_v58 = vadd.f32 %v3721_v44, %v3678_v62  ;;  %v1773_v41 = vadd.f32 %v3751_v8, %v1540_v26 }
 0x142   : > { %v3788_v12 = vpop.f32.mrf.mxu1  ;;  %v1542_v34 = vadd.f32 %v3755_v10, %v1312_v3  ;;  %v1772_v62 = vadd.f32 %v3753_v17, %v1539_v20  ;;  %v1316_v63 = vadd.f32 %v3727_v48, %v1086_v40  ;;  %v3962_v48 = vld [vmem:[#allocation7_spill] sm:$0xff] }
 0x143   : > { %v3799_v51 = vpop.f32.mrf.mxu0  ;;  %v1771_v50 = vadd.f32 %v2976_v5, %v1538_v28  ;;  %v1314_v38 = vadd.f32 %v3719_v43, %v1084_v4  ;;  %v1313_v31 = vadd.f32 %v3723_v45, %v1083_v58  ;;  %v1085_v43 = vadd.f32 %v3729_v49, %v3682_v7  ;;  %v3968_v58 = vld [vmem:[#allocation15_spill] sm:$0xff] }
 0x144   : > { %v3797_v27 = vpop.f32.mrf.mxu1  ;;  %v1088_v45 = vadd.f32 %v3733_v52, %v3684_v13  ;;  %v3964_v3 = vld [vmem:[#allocation16_spill] sm:$0xff] }
 0x145   : > { %v3806_v19 = vpop.f32.mrf.mxu0  ;;  %v1544_v2 = vadd.f32 %v3763_v61, %v1314_v38  ;;  %v1543_v7 = vadd.f32 %v3768_v60, %v1313_v31  ;;  %v1546_v4 = vadd.f32 %v3964_v3, %v1316_v63  ;;  %v3969_v38 = vld [vmem:[#allocation8_spill] sm:$0xff] }
 0x146   : > { %v3804_v16 = vpop.f32.mrf.mxu1 }
 0x147   : > { %v3025_v29 = vpop.f32.mrf.mxu0 }
 0x148   : > { %v2999_v18 = vpop.f32.mrf.mxu1 }
 0x149   : > { %v1999_v1 = vadd.f32 %v2999_v18, %v1769_v14  ;;  %v2149_v55 = vpop.f32.mrf.mxu0  ;;  %v1541_v14 = vadd.f32 %v3759_v22, %v1311_v37  ;;  %v1775_v18 = vadd.f32 %v3757_v21, %v1542_v34 }
 0x14a   : > { %v1919_v33 = vpop.f32.mrf.mxu1 }
 0x14b   : > { %v2229_v36 = vadd.f32 %v3025_v29, %v1999_v1  ;;  %v1998_v0 = vadd.f32 %v1919_v33, %v1768_v56  ;;  %v3028_v39 = vpop.f32.mrf.mxu0  ;;  %v3959_v1 = vld [vmem:[#allocation13_spill] sm:$0xff] }
 0x14c   : > { %v3002_v54 = vpop.f32.mrf.mxu1  ;;  %v1774_v46 = vadd.f32 %v3959_v1, %v1541_v14  ;;  %v3960_v33 = vld [vmem:[#allocation5_spill] sm:$0xff]  ;;  %v3976_v1 = vld [vmem:[#allocation19_spill] sm:$0xff] }
 0x14d   : > { %v2252_v5 = vadd.f32 %v3818_v32, %v2229_v36  ;;  %v2228_v11 = vadd.f32 %v2149_v55, %v1998_v0  ;;  %v2001_v24 = vadd.f32 %v3002_v54, %v1771_v50  ;;  %v2159_v30 = vpop.f32.mrf.mxu0  ;;  %v1315_v55 = vadd.f32 %v3960_v33, %v1085_v43  ;;  %v3961_v50 = vld [vmem:[#allocation2_spill] sm:$0xff] }
 0x14e   : > { %v1929_v15 = vpop.f32.mrf.mxu1  ;;  %v1087_v36 = vadd.f32 %v3962_v48, %v3961_v50  ;;  %v3963_v0 = vld [vmem:[#allocation14_spill] sm:$0xff] }
 0x14f   : > { %2269 = vst.msk [vmem:[%s3826_s30 + $0x8] sm:$0xff] %vm2267_vm2, %v2252_v5  ;;  %v2251_v9 = vadd.f32 %v3818_v32, %v2228_v11  ;;  %v2231_v23 = vadd.f32 %v3028_v39, %v2001_v24  ;;  %v2000_v25 = vadd.f32 %v1929_v15, %v1770_v6  ;;  %v3031_v8 = vpop.f32.mrf.mxu0  ;;  %v1777_v13 = vadd.f32 %v3963_v0, %v1544_v2  ;;  %v3965_v6 = vld [vmem:[#allocation6_spill] sm:$0xff]  ;;  %v3966_v11 = vld [vmem:[#allocation3_spill] sm:$0xff]  ;;  %v3967_v24 = vld [vmem:[#allocation9_spill] sm:$0xff] }
 0x150   : > { %v3005_v44 = vpop.f32.mrf.mxu1  ;;  %v1318_v5 = vadd.f32 %v3965_v6, %v1088_v45  ;;  %v1090_v37 = vadd.f32 %v3967_v24, %v3966_v11  ;;  %v1545_v34 = vadd.f32 %v3777_v53, %v1315_v55  ;;  %v1317_v40 = vadd.f32 %v3969_v38, %v1087_v36 }
 0x151   : > { %2268 = vst.msk [vmem:[%s3826_s30] sm:$0xff] %vm2267_vm2, %v2251_v9  ;;  %v2254_v10 = vadd.f32 %v3818_v32, %v2231_v23  ;;  %v2230_v28 = vadd.f32 %v2159_v30, %v2000_v25  ;;  %v2003_v42 = vadd.f32 %v3005_v44, %v1773_v41  ;;  %v2169_v17 = vpop.f32.mrf.mxu0  ;;  %v1776_v41 = vadd.f32 %v3968_v58, %v1543_v7  ;;  %v3971_v44 = vld [vmem:[#allocation11_spill] sm:$0xff] }
 0x152   : > { %v1939_v47 = vpop.f32.mrf.mxu1  ;;  %v1548_v14 = vadd.f32 %v3782_v59, %v1318_v5 }
 0x153   : > { %2271 = vst.msk [vmem:[%s3826_s30 + $0x18] sm:$0xff] %vm2267_vm2, %v2254_v10  ;;  %v2253_v22 = vadd.f32 %v3818_v32, %v2230_v28  ;;  %v2233_v29 = vadd.f32 %v3031_v8, %v2003_v42  ;;  %v2002_v56 = vadd.f32 %v1939_v47, %v1772_v62  ;;  %v3034_v61 = vpop.f32.mrf.mxu0  ;;  %v3970_v62 = vld [vmem:[#allocation4_spill] sm:$0xff]  ;;  %v3972_v42 = vld [vmem:[#allocation17_spill] sm:$0xff]  ;;  %v3973_v47 = vld [vmem:[#allocation10_spill] sm:$0xff] }
 0x154   : > { %v3008_v49 = vpop.f32.mrf.mxu1  ;;  %v1089_v8 = vadd.f32 %v3971_v44, %v3970_v62  ;;  %v1779_v31 = vadd.f32 %v3972_v42, %v1546_v4 }
 0x155   : > { %2270 = vst.msk [vmem:[%s3826_s30 + $0x10] sm:$0xff] %vm2267_vm2, %v2253_v22  ;;  %v2256_v21 = vadd.f32 %v3818_v32, %v2233_v29  ;;  %v2232_v35 = vadd.f32 %v2169_v17, %v2002_v56  ;;  %v2005_v26 = vadd.f32 %v3008_v49, %v1775_v18  ;;  %v2179_v60 = vpop.f32.mrf.mxu0  ;;  %v1320_v17 = vadd.f32 %v3973_v47, %v1090_v37  ;;  %v3974_v56 = vld [vmem:[#allocation18_spill] sm:$0xff]  ;;  %v3975_v49 = vld [vmem:[#allocation12_spill] sm:$0xff] }
 0x156   : > { %v1949_v52 = vpop.f32.mrf.mxu1  ;;  %v1547_v18 = vadd.f32 %v3788_v12, %v1317_v40  ;;  %v1778_v63 = vadd.f32 %v3974_v56, %v1545_v34 }
 0x157   : > { %2273 = vst.msk [vmem:[%s3826_s30 + $0x28] sm:$0xff] %vm2267_vm2, %v2256_v21  ;;  %v2255_v20 = vadd.f32 %v3818_v32, %v2232_v35  ;;  %v2235_v54 = vadd.f32 %v3034_v61, %v2005_v26  ;;  %v2004_v39 = vadd.f32 %v1949_v52, %v1774_v46  ;;  %v3037_v30 = vpop.f32.mrf.mxu0  ;;  %v1319_v61 = vadd.f32 %v3975_v49, %v1089_v8 }
 0x158   : > { %v3011_v15 = vpop.f32.mrf.mxu1  ;;  %v1781_v46 = vadd.f32 %v3976_v1, %v1548_v14  ;;  %v1550_v26 = vadd.f32 %v3797_v27, %v1320_v17  ;;  %v1780_v50 = vadd.f32 %v3790_v57, %v1547_v18 }
 0x159   : > { %2272 = vst.msk [vmem:[%s3826_s30 + $0x20] sm:$0xff] %vm2267_vm2, %v2255_v20  ;;  %v2258_v9 = vadd.f32 %v3818_v32, %v2235_v54  ;;  %v2234_v23 = vadd.f32 %v2179_v60, %v2004_v39  ;;  %v2007_v25 = vadd.f32 %v3011_v15, %v1777_v13  ;;  %v2189_v28 = vpop.f32.mrf.mxu0  ;;  %v1549_v0 = vadd.f32 %v3804_v16, %v1319_v61 }
 0x15a   : > { %v1959_v10 = vpop.f32.mrf.mxu1  ;;  %v1783_v4 = vadd.f32 %v3799_v51, %v1550_v26 }
 0x15b   : > { %2275 = vst.msk [vmem:[%s3826_s30 + $0x38] sm:$0xff] %vm2267_vm2, %v2258_v9  ;;  %v2257_v53 = vadd.f32 %v3818_v32, %v2234_v23  ;;  %v2237_v43 = vadd.f32 %v3037_v30, %v2007_v25  ;;  %v2006_v2 = vadd.f32 %v1959_v10, %v1776_v41  ;;  %v3040_v29 = vpop.f32.mrf.mxu0  ;;  %v1782_v6 = vadd.f32 %v3806_v19, %v1549_v0 }
 0x15c   : > { %v3014_v22 = vpop.f32.mrf.mxu1 }
 0x15d   : > { %2274 = vst.msk [vmem:[%s3826_s30 + $0x30] sm:$0xff] %vm2267_vm2, %v2257_v53  ;;  %v2260_v59 = vadd.f32 %v3818_v32, %v2237_v43  ;;  %v2236_v45 = vadd.f32 %v2189_v28, %v2006_v2  ;;  %v2009_v7 = vadd.f32 %v3014_v22, %v1779_v31  ;;  %v2199_v35 = vpop.f32.mrf.mxu0 }
 0x15e   : > { %v1969_v21 = vpop.f32.mrf.mxu1 }
 0x15f   : > { %2277 = vst.msk [vmem:[%s3826_s30 + $0x48] sm:$0xff] %vm2267_vm2, %v2260_v59  ;;  %v2259_v12 = vadd.f32 %v3818_v32, %v2236_v45  ;;  %v2239_v33 = vadd.f32 %v3040_v29, %v2009_v7  ;;  %v2008_v55 = vadd.f32 %v1969_v21, %v1778_v63  ;;  %v3043_v36 = vpop.f32.mrf.mxu0 }
 0x160   : > { %v3017_v48 = vpop.f32.mrf.mxu1 }
 0x161   : > { %2276 = vst.msk [vmem:[%s3826_s30 + $0x40] sm:$0xff] %vm2267_vm2, %v2259_v12  ;;  %v2262_v13 = vadd.f32 %v3818_v32, %v2239_v33  ;;  %v2238_v52 = vadd.f32 %v2199_v35, %v2008_v55  ;;  %v2011_v27 = vadd.f32 %v3017_v48, %v1781_v46  ;;  %v2209_v3 = vpop.f32.mrf.mxu0 }
 0x162   : > { %v1979_v60 = vpop.f32.mrf.mxu1 }
 0x163   : > { %2279 = vst.msk [vmem:[%s3826_s30 + $0x58] sm:$0xff] %vm2267_vm2, %v2262_v13  ;;  %v2261_v57 = vadd.f32 %v3818_v32, %v2238_v52  ;;  %v2241_v20 = vadd.f32 %v3043_v36, %v2011_v27  ;;  %v2010_v54 = vadd.f32 %v1979_v60, %v1780_v50  ;;  %v3046_v16 = vpop.f32.mrf.mxu0 }
 0x164   : > { %v3020_v39 = vpop.f32.mrf.mxu1 }
 0x165   : > { %2278 = vst.msk [vmem:[%s3826_s30 + $0x50] sm:$0xff] %vm2267_vm2, %v2261_v57  ;;  %v2264_v5 = vadd.f32 %v3818_v32, %v2241_v20  ;;  %v2240_v11 = vadd.f32 %v2209_v3, %v2010_v54  ;;  %v2013_v24 = vadd.f32 %v3020_v39, %v1783_v4  ;;  %v2219_v15 = vpop.f32.mrf.mxu0 }
 0x166   : > { %v1989_v51 = vpop.f32.mrf.mxu1 }
 0x167   : > { %2281 = vst.msk [vmem:[%s3826_s30 + $0x68] sm:$0xff] %vm2267_vm2, %v2264_v5  ;;  %v2263_v37 = vadd.f32 %v3818_v32, %v2240_v11  ;;  %v2243_v58 = vadd.f32 %v3046_v16, %v2013_v24  ;;  %v2012_v41 = vadd.f32 %v1989_v51, %v1782_v6 }
 0x169   : > { %2280 = vst.msk [vmem:[%s3826_s30 + $0x60] sm:$0xff] %vm2267_vm2, %v2263_v37  ;;  %v2266_v30 = vadd.f32 %v3818_v32, %v2243_v58  ;;  %v2242_v19 = vadd.f32 %v2219_v15, %v2012_v41 }
 0x16b   : > { %2283 = vst.msk [vmem:[%s3826_s30 + $0x78] sm:$0xff] %vm2267_vm2, %v2266_v30  ;;  %v2265_v34 = vadd.f32 %v3818_v32, %v2242_v19 }
 0x16d   : > { %2282 = vst.msk [vmem:[%s3826_s30 + $0x70] sm:$0xff] %vm2267_vm2, %v2265_v34 }
 0x16e PF: > { %s13_s16 = sadd.s32 1, %s3128_s16   ;;  %s3977_s12 = smov %s3120_s14 }
 0x16f   : > { %p10_p7 = scmp.ge.s32.totalorder %s13_s16, 6   ;;  %s3978_s13 = smov %s3124_s15 }
 0x170   : > { %s3979_s14 = smov %s3982_s17  ;;  %s3980_s15 = smov %s3986_s18 }
 0x171   :  { %12 = sbr.rel (!%p10_p7) target bundleno = 3 (0x3), region = 73 }

</bundles_post_ra>
